<compile_context>
chip_gen: v7x
topology: tpu7x:2x2x1
jax: 0.10.0
libtpu: 0.0.40
codegen_flags: <defaults>
</compile_context>

<pallas_src>
import math

import jax
import jax.numpy as jnp
from jax.experimental import pallas as pl
from jax.experimental.pallas import tpu as pltpu


def _unflatten_kernel(img_ref, mask_ref, out_ref):
    # img_ref : (1, 1, L)  one flattened row-tile of the raw mosaic (L = tile_h*W)
    # mask_ref: (C, L)     MSFA replicated to block granularity, VMEM-resident
    # out_ref : (1, C, L)  broadcast elementwise product (pure VPU, HBM-write bound)
    out_ref[...] = img_ref[...] * mask_ref[...][None]


def _plan_tiling(B, H, W, h, C, itemsize):
    """Pick tile_h (rows per block) and the VMEM limit for the flattened layout.

    Constraints:
      * tile_h % h == 0                     -> MSFA phase alignment per block
      * (tile_h * W) % 128 == 0 (or full H) -> lane-dense output stores / DMA
      * 2*out + 2*mask + 2*in tiles fit the per-generation VMEM budget
      * enough grid steps for both v7x TensorCores and pipeline overlap
    """
    lane_unit = 128 // math.gcd(128, W)          # rows needed for 128-lane alignment
    unit = math.lcm(h, lane_unit)                # also MSFA-period aligned

    try:
        vmem_cap = int(pltpu.get_tpu_info().vmem_capacity_bytes)
    except Exception:
        vmem_cap = 64 * 1024 * 1024              # v7x per-TensorCore; safe lower bound
    budget = int(vmem_cap * 0.6)                 # headroom for compiler scratch etc.

    # Worst-case residency per step: 2x out + 2x mask + 2x in tiles.
    per_row = (4 * C + 2) * W * itemsize
    out_row = max(1, C * W * itemsize)

    tile_h = min(
        H,
        max(1, budget // per_row),
        max(1, (16 * 1024 * 1024) // out_row),   # output tile <= ~16 MiB (roofline sweet spot)
    )

    if unit >= H:
        tile_h = H                               # single full-H block (full-dim lane extent)
    else:
        tile_h = max(unit, (tile_h // unit) * unit)

        # Ensure enough grid steps for megacore sharding / pipelining.
        cdiv = lambda a, b: -(-a // b)
        nt = cdiv(H, tile_h)
        max_nt = cdiv(H, unit)
        min_steps = 8
        if B * nt < min_steps and max_nt > nt:
            target_nt = min(max_nt, cdiv(min_steps, B))
            cand = max(unit, cdiv(cdiv(H, target_nt), unit) * unit)
            if cand < tile_h:
                tile_h = cand

    needed = (4 * C + 2) * tile_h * W * itemsize
    vmem_limit = int(min(int(vmem_cap * 0.9), max(needed + (8 << 20), 32 << 20)))
    return tile_h, vmem_limit


def unflatten(img: jnp.ndarray, msfa: jnp.ndarray) -> jnp.ndarray:
    """Unflatten a raw (B, 1, H, W) mosaic image into (B, C, H, W) using the MSFA.

    msfa has shape (C, h, w); H % h == 0 and W % w == 0 are required.
    """
    # _ensure_batch equivalent: promote missing batch / channel dims.
    if img.ndim == 2:
        img = img[None, None]
    elif img.ndim == 3:
        img = img[None]
    B, one, H, W = img.shape
    assert one == 1, "input must have a singleton channel dimension"
    C, h, w = msfa.shape
    assert H % h == 0 and W % w == 0, "spatial dims must be multiples of MSFA period"

    dtype = img.dtype
    itemsize = jnp.dtype(dtype).itemsize

    tile_h, vmem_limit = _plan_tiling(B, H, W, h, C, itemsize)
    L = tile_h * W
    nt = -(-H // tile_h)  # ceil-div; last block may be partial (Pallas masks it)

    # Flatten spatial dims (free, contiguous) so the lane dim is L >> 128.
    img_flat = img.reshape(B, 1, H * W)
    # Replicate the tiny MSFA only to block granularity; constant block index
    # -> fetched into VMEM once and reused for every grid step.
    mask_flat = jnp.tile(msfa.astype(dtype), (1, tile_h // h, W // w)).reshape(C, L)

    cost = pl.CostEstimate(
        flops=B * C * H * W,
        transcendentals=0,
        bytes_accessed=(B * H * W + B * C * H * W + C * L) * itemsize,
    )

    def build_and_call(mask_pipeline_mode):
        mask_kwargs = {}
        if mask_pipeline_mode is not None:
            mask_kwargs["pipeline_mode"] = mask_pipeline_mode
        return pl.pallas_call(
            _unflatten_kernel,
            out_shape=jax.ShapeDtypeStruct((B, C, H * W), dtype),
            grid=(B, nt),
            in_specs=[
                pl.BlockSpec((1, 1, L), lambda b, t: (b, 0, t)),
                pl.BlockSpec((C, L), lambda b, t: (0, 0), **mask_kwargs),
            ],
            out_specs=pl.BlockSpec((1, C, L), lambda b, t: (b, 0, t)),
            compiler_params=pltpu.CompilerParams(
                dimension_semantics=("parallel", "parallel"),
                vmem_limit_bytes=vmem_limit,
            ),
            cost_estimate=cost,
        )(img_flat, mask_flat)

    try:
        # Mask block never changes -> single buffer frees one tile's worth of VMEM.
        out_flat = build_and_call(pl.Buffered(1))
    except Exception:
        # Fallback if single-buffered pipeline_mode is unsupported on this version.
        out_flat = build_and_call(None)

    return out_flat.reshape(B, C, H, W)


if __name__ == "__main__":
    key = jax.random.PRNGKey(0)

    # Deterministic MSFA "parameter": a 4-band 2x2 mosaic (Bayer-like, one-hot
    # per spatial position in the pattern).  Shapes match nn.Parameter(msfa).
    C, ph, pw = 4, 2, 2
    msfa = jnp.zeros((C, ph, pw), dtype=jnp.float32)
    for c in range(C):
        msfa = msfa.at[c, c // pw, c % pw].set(1.0)

    # Raw mosaic image, NCHW with singleton channel.
    B, H, W = 2, 16, 16
    img = jax.random.uniform(key, (B, 1, H, W), dtype=jnp.float32)

    out = unflatten(img, msfa)
    out = jax.block_until_ready(out)

    # Pure-JAX reference check.
    mask_ref = jnp.tile(msfa, (1, H // ph, W // pw))          # (C, H, W)
    ref = img * mask_ref[None]                                # (B, C, H, W)
    assert out.shape == (B, C, H, W)
    assert jnp.allclose(out, ref, atol=0.0, rtol=0.0), "mismatch vs reference"

    print("KERNEL_OK")
</pallas_src>

<mosaic_0001>
module attributes {stable_mosaic.version = 11 : i64} {
  func.func @_unflatten_kernel(%arg0: i32, %arg1: i32, %arg2: memref<1x1x128xf32, #tpu.memory_space<vmem>>, %arg3: memref<4x128xf32, #tpu.memory_space<vmem>>, %arg4: memref<1x4x128xf32, #tpu.memory_space<vmem>>) attributes {dimension_semantics = [#tpu.dimension_semantics<parallel>, #tpu.dimension_semantics<parallel>], iteration_bounds = array<i64: 2, 2>, scalar_prefetch = 0 : i64, scratch_operands = 0 : i64, tpu.core_type = #tpu.core_type<tc>, window_params = [{transform_indices = @transform_0, window_bounds = array<i64: 1, 1, 128>}, {pipeline_mode = #tpu.pipeline_mode<synchronous>, transform_indices = @transform_1, window_bounds = array<i64: 4, 128>}, {transform_indices = @transform_2, window_bounds = array<i64: 1, 4, 128>}]} {
    %c0 = arith.constant 0 : index
    %c0_0 = arith.constant 0 : index
    %c0_1 = arith.constant 0 : index
    %0 = vector.load %arg2[%c0, %c0_0, %c0_1] : memref<1x1x128xf32, #tpu.memory_space<vmem>>, vector<1x1x128xf32>
    %c0_2 = arith.constant 0 : index
    %c0_3 = arith.constant 0 : index
    %1 = vector.load %arg3[%c0_2, %c0_3] : memref<4x128xf32, #tpu.memory_space<vmem>>, vector<4x128xf32>
    %2 = vector.shape_cast %1 : vector<4x128xf32> to vector<1x4x128xf32>
    %3 = vector.broadcast %0 : vector<1x1x128xf32> to vector<1x4x128xf32>
    %4 = arith.mulf %3, %2 : vector<1x4x128xf32>
    %c0_4 = arith.constant 0 : index
    %c0_5 = arith.constant 0 : index
    %c0_6 = arith.constant 0 : index
    %5 = vector.load %arg4[%c0_4, %c0_5, %c0_6] : memref<1x4x128xf32, #tpu.memory_space<vmem>>, vector<1x4x128xf32>
    tpu.vector_store %arg4[%c0_4, %c0_5, %c0_6], %4 {strides = array<i32>} : memref<1x4x128xf32, #tpu.memory_space<vmem>>, vector<1x4x128xf32>,
    return
  }
  func.func @transform_0(%arg0: i32, %arg1: i32) -> (i32, i32, i32) {
    %c0_i32 = arith.constant 0 : i32
    %c0_i32_0 = arith.constant 0 : i32
    return %arg0, %c0_i32, %arg1 : i32, i32, i32
  }
  func.func @transform_1(%arg0: i32, %arg1: i32) -> (i32, i32) {
    %c0_i32 = arith.constant 0 : i32
    %c0_i32_0 = arith.constant 0 : i32
    %c0_i32_1 = arith.constant 0 : i32
    return %c0_i32, %c0_i32_0 : i32, i32
  }
  func.func @transform_2(%arg0: i32, %arg1: i32) -> (i32, i32, i32) {
    %c0_i32 = arith.constant 0 : i32
    %c0_i32_0 = arith.constant 0 : i32
    return %arg0, %c0_i32, %arg1 : i32, i32, i32
  }
}

module attributes {stable_mosaic.version = 11 : i64} {
  func.func @_unflatten_kernel(%arg0: i32, %arg1: i32, %arg2: memref<1x1x128xf32, #tpu.memory_space<vmem>>, %arg3: memref<4x128xf32, #tpu.memory_space<vmem>>, %arg4: memref<1x4x128xf32, #tpu.memory_space<vmem>>) attributes {dimension_semantics = [#tpu.dimension_semantics<parallel>, #tpu.dimension_semantics<parallel>], iteration_bounds = array<i64: 2, 2>, scalar_prefetch = 0 : i64, scratch_operands = 0 : i64, tpu.core_type = #tpu.core_type<tc>, window_params = [{transform_indices = @transform_0, window_bounds = array<i64: 1, 1, 128>}, {pipeline_mode = #tpu.pipeline_mode<synchronous>, transform_indices = @transform_1, window_bounds = array<i64: 4, 128>}, {transform_indices = @transform_2, window_bounds = array<i64: 1, 4, 128>}]} {
    %c0 = arith.constant 0 : index
    %c0_0 = arith.constant 0 : index
    %c0_1 = arith.constant 0 : index
    %0 = vector.load %arg2[%c0, %c0_0, %c0_1] : memref<1x1x128xf32, #tpu.memory_space<vmem>>, vector<1x1x128xf32>
    %c0_2 = arith.constant 0 : index
    %c0_3 = arith.constant 0 : index
    %1 = vector.load %arg3[%c0_2, %c0_3] : memref<4x128xf32, #tpu.memory_space<vmem>>, vector<4x128xf32>
    %2 = vector.shape_cast %1 : vector<4x128xf32> to vector<1x4x128xf32>
    %3 = vector.broadcast %0 : vector<1x1x128xf32> to vector<1x4x128xf32>
    %4 = arith.mulf %3, %2 : vector<1x4x128xf32>
    %c0_4 = arith.constant 0 : index
    %c0_5 = arith.constant 0 : index
    %c0_6 = arith.constant 0 : index
    %5 = vector.load %arg4[%c0_4, %c0_5, %c0_6] : memref<1x4x128xf32, #tpu.memory_space<vmem>>, vector<1x4x128xf32>
    tpu.vector_store %arg4[%c0_4, %c0_5, %c0_6], %4 {strides = array<i32>} : memref<1x4x128xf32, #tpu.memory_space<vmem>>, vector<1x4x128xf32>,
    return
  }
  func.func @transform_0(%arg0: i32, %arg1: i32) -> (i32, i32, i32) {
    %c0_i32 = arith.constant 0 : i32
    %c0_i32_0 = arith.constant 0 : i32
    return %arg0, %c0_i32, %arg1 : i32, i32, i32
  }
  func.func @transform_1(%arg0: i32, %arg1: i32) -> (i32, i32) {
    %c0_i32 = arith.constant 0 : i32
    %c0_i32_0 = arith.constant 0 : i32
    %c0_i32_1 = arith.constant 0 : i32
    return %c0_i32, %c0_i32_0 : i32, i32
  }
  func.func @transform_2(%arg0: i32, %arg1: i32) -> (i32, i32, i32) {
    %c0_i32 = arith.constant 0 : i32
    %c0_i32_0 = arith.constant 0 : i32
    return %arg0, %c0_i32, %arg1 : i32, i32, i32
  }
}

</mosaic_0001>

<bundles_post_ra>
// kernel: tpu_custom_call.1
= control target key start
LH: loop header
LB: loop body
LE: loop exit
PB: predicated region body
PF: predicated region fallthrough
CT: control target
= control target key end

     0   :  { %s825_s0 = inlined_call_operand.hbm [shape: f32[2,1,256], index: 0, kind: input, shape index: {}]   ;;  %s826_s1 = inlined_call_operand.hbm [shape: f32[4,128], index: 1, kind: input, shape index: {}]   ;;  %s827_s2 = inlined_call_operand.hbm [shape: f32[2,4,256], index: 2, kind: output, shape index: {}]  }
   0x1   :  { %833 = sst [smem:[#allocation12_spill]] %s826_s1 }
   0x2   :  { %7 = vsyncpa [#allocation3], 0 }
   0x3   :  { %9 = vsyncpa [#allocation3 + $0x1], 0 }
   0x4   :  { %10 = vsyncpa [#allocation6], 0 }
   0x5   :  { %11 = vsyncpa [#allocation4], 0 }
   0x6   :  { %13 = vsyncpa [#allocation4 + $0x1], 0  ;;  %s590_s9 = smov 0   ;;  %s592_s10 = smov 0  }
   0x7   :  { %s594_s11 = smov 0   ;;  %s596_s12 = smov 0  }
   0x8   :  { %s598_s13 = smov 0   ;;  %s600_s14 = smov 0  }
   0x9   :  { %s602_s15 = smov 0   ;;  %s604_s16 = smov 0  }
   0xa LB: > { %s305_s17 = sadd.s32 4294967295, %s570_s16   ;;  %s306_s18 = sadd.s32 4294967294, %s570_s16   ;;  %s570_s16 = sphi %s604_s16, %s19_s16   ;;  %s566_s15 = sphi %s602_s15, %s855_s15   ;;  %s562_s14 = sphi %s600_s14, %s854_s14   ;;  %s558_s13 = sphi %s598_s13, %s853_s13   ;;  %s554_s12 = sphi %s596_s12, %s852_s12   ;;  %s550_s11 = sphi %s594_s11, %s851_s11   ;;  %s546_s10 = sphi %s592_s10, %s850_s10   ;;  %s542_s9 = sphi %s590_s9, %s849_s9  }
   0xb   : > { %p53_p0 = scmp.ne.s32.totalorder %s546_s10, %s542_s9  ;;  %p636_p1 = scmp.eq.s32.totalorder %s305_s17, 0 }
   0xc   : > { %p106_p2 = scmp.eq.s32.totalorder %s306_s18, 3  ;;  %p307_p4 = scmp.ge.s32.totalorder %s570_s16, 1 }
   0xd   : > { %s834_s19 = scalar_select %p636_p1, 1, 0 }
   0xe   : > { %p642_p3 = por %p636_p1, %p53_p0  ;;  %p647_p5 = por %p106_p2, %p53_p0 }
   0xf   : > { %p113_p6 = scmp.lt.s32.totalorder %s570_s16, 5  ;;  %s572_s23 = smov [#allocation5]  }
  0x10   : > { %s835_s20 = scalar_select %p642_p3, 1, 0 }
  0x11   : > { %s836_s21 = scalar_select %p647_p5, 1, 0 }
  0x12   : > { %p652_p7 = pnand %p307_p4, %p113_p6  ;;  %s126_s24 = sshll.u32 %s572_s23, 4  ;;  %s127_s24 = int_to_ptr.vmem [resolvable:$true] %s126_s24 }
  0x13   : > { %s28_s26 = sadd.s32 1, %s562_s14  ;;  %s839_s1 = sld [smem:[#allocation12_spill]] }
  0x14   : > { %s837_s22 = scalar_select %p652_p7, 1, 0 }
  0x15   : > { %p329_p8 = pneg %p652_p7 }
  0x17   : > { %p660_p9 = pnand %p329_p8, %p636_p1 }
  0x19   : > { %s410_s29 = scalar_lea.hbm %s839_s1, 64  ;;  %p412_p11 = pneg %p660_p9 }
  0x1a   : > { %p411_p10 = scmp.ne.s32.totalorder %s839_s1, %s410_s29  ;;  %p417_p0 = scmp.lt.u32.totalorder %s410_s29, %s839_s1 }
  0x1c   : > { %p413_p12 = pnand %p412_p11, %p411_p10 }
  0x1e   : > { %p414_p13 = pneg %p413_p12 }
  0x20   : > { %p419_p2 = pnand %p417_p0, %p414_p13 }
  0x22   : > { %422 = shalt.err (!%p419_p2)
}
  0x23   : > { %s423_s6 = scalar_lea.vmem %s127_s24, 64  ;;  %p431_p5 = scmp.lt.s32.totalorder %s127_s24, %s127_s24 }
  0x24   : > { %p424_p4 = scmp.ne.s32.totalorder %s127_s24, %s423_s6  ;;  %p432_p1 = scmp.lt.s32.totalorder %s423_s6, %s423_s6 }
  0x26   : > { %p426_p6 = pnand %p424_p4, %p412_p11  ;;  %p433_p3 = por %p432_p1, %p431_p5 }
  0x28   : > { %p427_p8 = pneg %p426_p6 }
  0x2a   : > { %p434_p7 = pnand %p433_p3, %p427_p8 }
  0x2c   : > { %437 = shalt.err (!%p434_p7)
}
  0x2d   : > { %332 = dma.hbm_to_vmem [thread:$0]  (!%p660_p9), %s839_s1, 64, %s127_s24, [#allocation6]  }
  0x2e   : > { %p29_p1 = scmp.ge.s32.totalorder %s28_s26, 2  ;;  %s31_s18 = sadd.s32 1, %s566_s15 }
  0x2f   : > { %p100_p3 = scmp.eq.s32.totalorder %s305_s17, 3  ;;  %p47_p5 = scmp.ne.s32.totalorder %s550_s11, %s546_s10 }
  0x30   : > { %s857_s26 = smov (%p29_p1, %s28_s26), 0  ;;  %s859_s18 = smov (!%p29_p1, %s31_s18), %s566_s15 }
  0x31   : > { %840 = sst [smem:[#allocation11_spill]] %s857_s26  ;;  %s40_s23 = sadd.s32 1, %s550_s11 }
  0x32   : > { %p48_p7 = scmp.eq.s32.totalorder %s570_s16, 0  ;;  %p33_p10 = scmp.ge.s32.totalorder %s859_s18, 2 }
  0x33   : > { %p691_p11 = por %p100_p3, %p47_p5  ;;  %s36_s24 = ssub.s32 %s562_s14, %s857_s26 }
  0x34   : > { %p697_p9 = por %p48_p7, %p47_p5  ;;  %s861_s18 = smov (%p33_p10, %s859_s18), 0 }
  0x35   : > { %s137_s17 = sand.u32 1, %s550_s11   ;;  %s310_s28 = sshll.u32 %s566_s15, 1 }
  0x36   : > { %s35_s29 = ssub.s32 %s566_s15, %s861_s18  ;;  %p342_p12 = scmp.lt.s32.totalorder %s570_s16, 4 }
  0x37   : > { %s37_s30 = sor.u32 %s36_s24, %s35_s29  ;;  %s145_s3 = sadd.s32 %s562_s14, %s310_s28 }
  0x38   : > { %p38_p13 = scmp.eq.s32.totalorder %s37_s30, 0  ;;  %s311_s4 = sshll.u32 %s145_s3, 4 }
  0x39   : > { %s140_s5 = scalar_lea.vmem [#allocation2], %s137_s17  ;;  %s715_s26 = scalar_lea.hbm %s825_s0, %s311_s4 }
  0x3a   : > { %s149_s6 = sshll.u32 %s140_s5, 4  ;;  %p721_p0 = pnand %p342_p12, %p697_p9  ;;  %s717_s6 = int_to_ptr.vmem [resolvable:$true] %s149_s6 }
  0x3b   : > { %s710_s7 = scalar_select %p38_p13, %s550_s11, %s40_s23  }
  0x3c   : > { %s138_s23 = scalar_lea.sflag [#allocation3], %s137_s17  ;;  %s438_s28 = scalar_lea.hbm %s715_s26, 16 }
  0x3d   : > { %p439_p2 = scmp.ne.s32.totalorder %s715_s26, %s438_s28  ;;  %p440_p4 = pneg %p721_p0 }
  0x3e   : > { %s443_s30 = scalar_lea.hbm %s825_s0, 64  ;;  %p444_p1 = scmp.lt.u32.totalorder %s715_s26, %s825_s0 }
  0x3f   : > { %p441_p6 = pnand %p440_p4, %p439_p2  ;;  %p445_p3 = scmp.lt.u32.totalorder %s443_s30, %s438_s28 }
  0x40   : > { %p447_p7 = scmp.lt.u32.totalorder %s438_s28, %s715_s26 }
  0x41   : > { %p442_p8 = pneg %p441_p6  ;;  %p446_p5 = por %p445_p3, %p444_p1 }
  0x43   : > { %p448_p10 = por %p447_p7, %p446_p5 }
  0x45   : > { %p449_p9 = pnand %p448_p10, %p442_p8 }
  0x47   : > { %452 = shalt.err (!%p449_p9)
}
  0x48   : > { %s453_s17 = scalar_lea.vmem %s717_s6, 16  ;;  %s573_s4 = smov [#allocation2]  }
  0x49   : > { %p454_p12 = scmp.ne.s32.totalorder %s717_s6, %s453_s17  ;;  %s458_s5 = sshll.u32 %s573_s4, 4  ;;  %s459_s5 = int_to_ptr.vmem [resolvable:$false] %s458_s5 }
  0x4a   : > { %s460_s8 = scalar_lea.vmem %s459_s5, 32  ;;  %p461_p6 = scmp.lt.s32.totalorder %s717_s6, %s459_s5 }
  0x4b   : > { %p456_p13 = pnand %p454_p12, %p440_p4  ;;  %p462_p1 = scmp.lt.s32.totalorder %s460_s8, %s453_s17 }
  0x4d   : > { %p457_p2 = pneg %p456_p13  ;;  %p463_p3 = por %p462_p1, %p461_p6 }
  0x4f   : > { %p464_p5 = pnand %p463_p3, %p457_p2 }
  0x51   : > { %467 = shalt.err (!%p464_p5)
}
  0x52   : > { %336 = dma.hbm_to_vmem [thread:$0]  (!%p721_p0), %s715_s26, 16, %s717_s6, %s138_s23  }
  0x53   : > { %p844_p8 = scmp.ne.s32.totalorder %s837_s22, 0 }
  0x54   : > { %s753_s28 = sand.u32 (!%p844_p8), 1, %s546_s10   ;;  %p845_p4 = scmp.ne.s32.totalorder (!%p844_p8), %s835_s20, 0 }
  0x55   : > { %158 = sbr.rel (%p844_p8) target bundleno = 122 (0x7a), region = 28  ;;  %s161_s1 = scalar_lea.sflag (!%p844_p8), [#allocation3], %s753_s28 }
  0x56   : > { %s163_s29 = scalar_lea.vmem (!%p844_p8), [#allocation2], %s753_s28 }
  0x5c   : > { %529 = dma.done.wait (%p845_p4), %s161_s1, 16  }
  0x5d   : > { %531 = vsyncadd (%p845_p4), %s161_s1, 4294967280  ;;  %p846_p7 = scmp.ne.s32.totalorder %s834_s19, 0 }
  0x5f   : > { %533 = dma.done.wait (%p846_p7), [#allocation6], 64  }
  0x60   : > { %535 = vsyncadd (%p846_p7), [#allocation6], 4294967232  ;;  %s314_s22 = sshll.u32 %s753_s28, 2  ;;  %s317_s26 = sshll.u32 %s558_s13, 1  ;;  %v315_v0 = vld [vmem:[%s163_s29] ss:$0 sm:$0xff] }
  0x61   : > { %s209_s6 = sadd.s32 %s554_s12, %s317_s26  ;;  %s186_s24 = scalar_lea.vmem [#allocation7], %s314_s22  ;;  %v188_v1 = vld [vmem:[#allocation5] sm:$0xf] }
  0x62   : > { %s213_s23 = sshll.u32 %s186_s24, 4  ;;  %s318_s30 = sshll.u32 %s209_s6, 6  ;;  %v195_v2 = vmul.f32 %v315_v0, %v188_v1  ;;  %s768_s23 = int_to_ptr.vmem [resolvable:$true] %s213_s23 }
  0x63   : > { %s773_s19 = scalar_lea.hbm %s827_s2, %s318_s30  ;;  %s198_s3 = scalar_lea.sflag [#allocation4], %s753_s28 }
  0x64   : > { %196 = vst [vmem:[%s186_s24] sm:$0xf] %v195_v2  ;;  %s468_s13 = scalar_lea.vmem %s768_s23, 64  ;;  %s574_s12 = smov [#allocation7]  }
  0x65   : > { %p469_p0 = scmp.ne.s32.totalorder %s768_s23, %s468_s13  ;;  %s472_s17 = sshll.u32 %s574_s12, 4  ;;  %s473_s17 = int_to_ptr.vmem [resolvable:$false] %s472_s17 }
  0x66   : > { %s474_s4 = scalar_lea.vmem %s473_s17, 128  ;;  %p475_p12 = scmp.lt.s32.totalorder %s768_s23, %s473_s17 }
  0x67   : > { %p470_p10 = pnand %p469_p0, %p691_p11  ;;  %p476_p13 = scmp.lt.s32.totalorder %s474_s4, %s468_s13 }
  0x69   : > { %p471_p9 = pneg %p470_p10  ;;  %p477_p2 = por %p476_p13, %p475_p12 }
  0x6b   : > { %p478_p6 = pnand %p477_p2, %p471_p9 }
  0x6d   : > { %481 = shalt.err (!%p478_p6)
}
  0x6e   : > { %s482_s5 = scalar_lea.hbm %s773_s19, 64  ;;  %s486_s1 = scalar_lea.hbm %s827_s2, 256 }
  0x6f   : > { %p483_p1 = scmp.ne.s32.totalorder %s773_s19, %s482_s5  ;;  %p487_p8 = scmp.lt.u32.totalorder %s773_s19, %s827_s2 }
  0x70   : > { %p488_p4 = scmp.lt.u32.totalorder %s486_s1, %s482_s5  ;;  %p490_p0 = scmp.lt.u32.totalorder %s482_s5, %s773_s19 }
  0x71   : > { %p484_p3 = pnand %p483_p1, %p691_p11 }
  0x72   : > { %p489_p7 = por %p488_p4, %p487_p8 }
  0x73   : > { %p485_p5 = pneg %p484_p3 }
  0x74   : > { %p491_p10 = por %p490_p0, %p489_p7 }
  0x76   : > { %p492_p9 = pnand %p491_p10, %p485_p5 }
  0x78   : > { %495 = shalt.err (!%p492_p9)
}
  0x79   : > { %327 = dma.vmem_to_hbm [thread:$0]  (%p691_p11), %s768_s23, 64, %s773_s19, %s198_s3  }
  0x7a PF: > { %p344_p12 = scmp.ge.s32.totalorder %s570_s16, 2  ;;  %s225_s26 = sand.u32 1, %s542_s9  }
  0x7b   : > { %p847_p13 = scmp.ne.s32.totalorder %s836_s21, 0  ;;  %s226_s6 = scalar_lea.sflag [#allocation4], %s225_s26 }
  0x7d   : > { %p338_p2 = pnand %p344_p12, %p847_p13 }
  0x7f   : > { %537 = dma.done.wait (!%p338_p2), %s226_s6, 64  }
  0x80   : > { %539 = vsyncadd (!%p338_p2), %s226_s6, 4294967232  ;;  %s19_s16 = sadd.s32 1, %s570_s16   ;;  %s848_s25 = sld [smem:[#allocation11_spill]] }
  0x81   : > { %p16_p6 = scmp.ge.s32.totalorder %s19_s16, 6   ;;  %s849_s9 = smov %s546_s10 }
  0x82   : > { %s850_s10 = smov %s550_s11  ;;  %s851_s11 = smov %s710_s7 }
  0x83   : > { %s852_s12 = smov %s562_s14  ;;  %s853_s13 = smov %s566_s15 }
  0x84   : > { %s855_s15 = smov %s861_s18  ;;  %18 = sbr.rel (!%p16_p6) target bundleno = 10 (0xa), region = 77 }
  0x86   : > { %s854_s14 = smov %s848_s25 }
  0x8b   :  { %231 = vsyncpa [#allocation3], 1 }
  0x8c   :  { %233 = vsyncpa [#allocation3 + $0x1], 1 }
  0x8d   :  { %234 = vsyncpa [#allocation6], 1 }
  0x8e   :  { %235 = vsyncpa [#allocation4], 1 }
  0x8f   :  { %237 = vsyncpa [#allocation4 + $0x1], 1 }

// kernel: tpu_custom_call.1
= control target key start
LH: loop header
LB: loop body
LE: loop exit
PB: predicated region body
PF: predicated region fallthrough
CT: control target
= control target key end

     0   :  { %s825_s0 = inlined_call_operand.hbm [shape: f32[2,1,256], index: 0, kind: input, shape index: {}]   ;;  %s826_s1 = inlined_call_operand.hbm [shape: f32[4,128], index: 1, kind: input, shape index: {}]   ;;  %s827_s2 = inlined_call_operand.hbm [shape: f32[2,4,256], index: 2, kind: output, shape index: {}]  }
   0x1   :  { %833 = sst [smem:[#allocation12_spill]] %s826_s1 }
   0x2   :  { %7 = vsyncpa [#allocation3], 0 }
   0x3   :  { %9 = vsyncpa [#allocation3 + $0x1], 0 }
   0x4   :  { %10 = vsyncpa [#allocation6], 0 }
   0x5   :  { %11 = vsyncpa [#allocation4], 0 }
   0x6   :  { %13 = vsyncpa [#allocation4 + $0x1], 0  ;;  %s590_s9 = smov 0   ;;  %s592_s10 = smov 0  }
   0x7   :  { %s594_s11 = smov 0   ;;  %s596_s12 = smov 0  }
   0x8   :  { %s598_s13 = smov 0   ;;  %s600_s14 = smov 0  }
   0x9   :  { %s602_s15 = smov 0   ;;  %s604_s16 = smov 0  }
   0xa LB: > { %s305_s17 = sadd.s32 4294967295, %s570_s16   ;;  %s306_s18 = sadd.s32 4294967294, %s570_s16   ;;  %s570_s16 = sphi %s604_s16, %s19_s16   ;;  %s566_s15 = sphi %s602_s15, %s855_s15   ;;  %s562_s14 = sphi %s600_s14, %s854_s14   ;;  %s558_s13 = sphi %s598_s13, %s853_s13   ;;  %s554_s12 = sphi %s596_s12, %s852_s12   ;;  %s550_s11 = sphi %s594_s11, %s851_s11   ;;  %s546_s10 = sphi %s592_s10, %s850_s10   ;;  %s542_s9 = sphi %s590_s9, %s849_s9  }
   0xb   : > { %p53_p0 = scmp.ne.s32.totalorder %s546_s10, %s542_s9  ;;  %p636_p1 = scmp.eq.s32.totalorder %s305_s17, 0 }
   0xc   : > { %p106_p2 = scmp.eq.s32.totalorder %s306_s18, 3  ;;  %p307_p4 = scmp.ge.s32.totalorder %s570_s16, 1 }
   0xd   : > { %s834_s19 = scalar_select %p636_p1, 1, 0 }
   0xe   : > { %p642_p3 = por %p636_p1, %p53_p0  ;;  %p647_p5 = por %p106_p2, %p53_p0 }
   0xf   : > { %p113_p6 = scmp.lt.s32.totalorder %s570_s16, 5  ;;  %s572_s23 = smov [#allocation5]  }
  0x10   : > { %s835_s20 = scalar_select %p642_p3, 1, 0 }
  0x11   : > { %s836_s21 = scalar_select %p647_p5, 1, 0 }
  0x12   : > { %p652_p7 = pnand %p307_p4, %p113_p6  ;;  %s126_s24 = sshll.u32 %s572_s23, 4  ;;  %s127_s24 = int_to_ptr.vmem [resolvable:$true] %s126_s24 }
  0x13   : > { %s28_s26 = sadd.s32 1, %s562_s14  ;;  %s839_s1 = sld [smem:[#allocation12_spill]] }
  0x14   : > { %s837_s22 = scalar_select %p652_p7, 1, 0 }
  0x15   : > { %p329_p8 = pneg %p652_p7 }
  0x17   : > { %p660_p9 = pnand %p329_p8, %p636_p1 }
  0x19   : > { %s410_s29 = scalar_lea.hbm %s839_s1, 64  ;;  %p412_p11 = pneg %p660_p9 }
  0x1a   : > { %p411_p10 = scmp.ne.s32.totalorder %s839_s1, %s410_s29  ;;  %p417_p0 = scmp.lt.u32.totalorder %s410_s29, %s839_s1 }
  0x1c   : > { %p413_p12 = pnand %p412_p11, %p411_p10 }
  0x1e   : > { %p414_p13 = pneg %p413_p12 }
  0x20   : > { %p419_p2 = pnand %p417_p0, %p414_p13 }
  0x22   : > { %422 = shalt.err (!%p419_p2)
}
  0x23   : > { %s423_s6 = scalar_lea.vmem %s127_s24, 64  ;;  %p431_p5 = scmp.lt.s32.totalorder %s127_s24, %s127_s24 }
  0x24   : > { %p424_p4 = scmp.ne.s32.totalorder %s127_s24, %s423_s6  ;;  %p432_p1 = scmp.lt.s32.totalorder %s423_s6, %s423_s6 }
  0x26   : > { %p426_p6 = pnand %p424_p4, %p412_p11  ;;  %p433_p3 = por %p432_p1, %p431_p5 }
  0x28   : > { %p427_p8 = pneg %p426_p6 }
  0x2a   : > { %p434_p7 = pnand %p433_p3, %p427_p8 }
  0x2c   : > { %437 = shalt.err (!%p434_p7)
}
  0x2d   : > { %332 = dma.hbm_to_vmem [thread:$0]  (!%p660_p9), %s839_s1, 64, %s127_s24, [#allocation6]  }
  0x2e   : > { %p29_p1 = scmp.ge.s32.totalorder %s28_s26, 2  ;;  %s31_s18 = sadd.s32 1, %s566_s15 }
  0x2f   : > { %p100_p3 = scmp.eq.s32.totalorder %s305_s17, 3  ;;  %p47_p5 = scmp.ne.s32.totalorder %s550_s11, %s546_s10 }
  0x30   : > { %s857_s26 = smov (%p29_p1, %s28_s26), 0  ;;  %s859_s18 = smov (!%p29_p1, %s31_s18), %s566_s15 }
  0x31   : > { %840 = sst [smem:[#allocation11_spill]] %s857_s26  ;;  %s40_s23 = sadd.s32 1, %s550_s11 }
  0x32   : > { %p48_p7 = scmp.eq.s32.totalorder %s570_s16, 0  ;;  %p33_p10 = scmp.ge.s32.totalorder %s859_s18, 2 }
  0x33   : > { %p691_p11 = por %p100_p3, %p47_p5  ;;  %s36_s24 = ssub.s32 %s562_s14, %s857_s26 }
  0x34   : > { %p697_p9 = por %p48_p7, %p47_p5  ;;  %s861_s18 = smov (%p33_p10, %s859_s18), 0 }
  0x35   : > { %s137_s17 = sand.u32 1, %s550_s11   ;;  %s310_s28 = sshll.u32 %s566_s15, 1 }
  0x36   : > { %s35_s29 = ssub.s32 %s566_s15, %s861_s18  ;;  %p342_p12 = scmp.lt.s32.totalorder %s570_s16, 4 }
  0x37   : > { %s37_s30 = sor.u32 %s36_s24, %s35_s29  ;;  %s145_s3 = sadd.s32 %s562_s14, %s310_s28 }
  0x38   : > { %p38_p13 = scmp.eq.s32.totalorder %s37_s30, 0  ;;  %s311_s4 = sshll.u32 %s145_s3, 4 }
  0x39   : > { %s140_s5 = scalar_lea.vmem [#allocation2], %s137_s17  ;;  %s715_s26 = scalar_lea.hbm %s825_s0, %s311_s4 }
  0x3a   : > { %s149_s6 = sshll.u32 %s140_s5, 4  ;;  %p721_p0 = pnand %p342_p12, %p697_p9  ;;  %s717_s6 = int_to_ptr.vmem [resolvable:$true] %s149_s6 }
  0x3b   : > { %s710_s7 = scalar_select %p38_p13, %s550_s11, %s40_s23  }
  0x3c   : > { %s138_s23 = scalar_lea.sflag [#allocation3], %s137_s17  ;;  %s438_s28 = scalar_lea.hbm %s715_s26, 16 }
  0x3d   : > { %p439_p2 = scmp.ne.s32.totalorder %s715_s26, %s438_s28  ;;  %p440_p4 = pneg %p721_p0 }
  0x3e   : > { %s443_s30 = scalar_lea.hbm %s825_s0, 64  ;;  %p444_p1 = scmp.lt.u32.totalorder %s715_s26, %s825_s0 }
  0x3f   : > { %p441_p6 = pnand %p440_p4, %p439_p2  ;;  %p445_p3 = scmp.lt.u32.totalorder %s443_s30, %s438_s28 }
  0x40   : > { %p447_p7 = scmp.lt.u32.totalorder %s438_s28, %s715_s26 }
  0x41   : > { %p442_p8 = pneg %p441_p6  ;;  %p446_p5 = por %p445_p3, %p444_p1 }
  0x43   : > { %p448_p10 = por %p447_p7, %p446_p5 }
  0x45   : > { %p449_p9 = pnand %p448_p10, %p442_p8 }
  0x47   : > { %452 = shalt.err (!%p449_p9)
}
  0x48   : > { %s453_s17 = scalar_lea.vmem %s717_s6, 16  ;;  %s573_s4 = smov [#allocation2]  }
  0x49   : > { %p454_p12 = scmp.ne.s32.totalorder %s717_s6, %s453_s17  ;;  %s458_s5 = sshll.u32 %s573_s4, 4  ;;  %s459_s5 = int_to_ptr.vmem [resolvable:$false] %s458_s5 }
  0x4a   : > { %s460_s8 = scalar_lea.vmem %s459_s5, 32  ;;  %p461_p6 = scmp.lt.s32.totalorder %s717_s6, %s459_s5 }
  0x4b   : > { %p456_p13 = pnand %p454_p12, %p440_p4  ;;  %p462_p1 = scmp.lt.s32.totalorder %s460_s8, %s453_s17 }
  0x4d   : > { %p457_p2 = pneg %p456_p13  ;;  %p463_p3 = por %p462_p1, %p461_p6 }
  0x4f   : > { %p464_p5 = pnand %p463_p3, %p457_p2 }
  0x51   : > { %467 = shalt.err (!%p464_p5)
}
  0x52   : > { %336 = dma.hbm_to_vmem [thread:$0]  (!%p721_p0), %s715_s26, 16, %s717_s6, %s138_s23  }
  0x53   : > { %p844_p8 = scmp.ne.s32.totalorder %s837_s22, 0 }
  0x54   : > { %s753_s28 = sand.u32 (!%p844_p8), 1, %s546_s10   ;;  %p845_p4 = scmp.ne.s32.totalorder (!%p844_p8), %s835_s20, 0 }
  0x55   : > { %158 = sbr.rel (%p844_p8) target bundleno = 122 (0x7a), region = 28  ;;  %s161_s1 = scalar_lea.sflag (!%p844_p8), [#allocation3], %s753_s28 }
  0x56   : > { %s163_s29 = scalar_lea.vmem (!%p844_p8), [#allocation2], %s753_s28 }
  0x5c   : > { %529 = dma.done.wait (%p845_p4), %s161_s1, 16  }
  0x5d   : > { %531 = vsyncadd (%p845_p4), %s161_s1, 4294967280  ;;  %p846_p7 = scmp.ne.s32.totalorder %s834_s19, 0 }
  0x5f   : > { %533 = dma.done.wait (%p846_p7), [#allocation6], 64  }
  0x60   : > { %535 = vsyncadd (%p846_p7), [#allocation6], 4294967232  ;;  %s314_s22 = sshll.u32 %s753_s28, 2  ;;  %s317_s26 = sshll.u32 %s558_s13, 1  ;;  %v315_v0 = vld [vmem:[%s163_s29] ss:$0 sm:$0xff] }
  0x61   : > { %s209_s6 = sadd.s32 %s554_s12, %s317_s26  ;;  %s186_s24 = scalar_lea.vmem [#allocation7], %s314_s22  ;;  %v188_v1 = vld [vmem:[#allocation5] sm:$0xf] }
  0x62   : > { %s213_s23 = sshll.u32 %s186_s24, 4  ;;  %s318_s30 = sshll.u32 %s209_s6, 6  ;;  %v195_v2 = vmul.f32 %v315_v0, %v188_v1  ;;  %s768_s23 = int_to_ptr.vmem [resolvable:$true] %s213_s23 }
  0x63   : > { %s773_s19 = scalar_lea.hbm %s827_s2, %s318_s30  ;;  %s198_s3 = scalar_lea.sflag [#allocation4], %s753_s28 }
  0x64   : > { %196 = vst [vmem:[%s186_s24] sm:$0xf] %v195_v2  ;;  %s468_s13 = scalar_lea.vmem %s768_s23, 64  ;;  %s574_s12 = smov [#allocation7]  }
  0x65   : > { %p469_p0 = scmp.ne.s32.totalorder %s768_s23, %s468_s13  ;;  %s472_s17 = sshll.u32 %s574_s12, 4  ;;  %s473_s17 = int_to_ptr.vmem [resolvable:$false] %s472_s17 }
  0x66   : > { %s474_s4 = scalar_lea.vmem %s473_s17, 128  ;;  %p475_p12 = scmp.lt.s32.totalorder %s768_s23, %s473_s17 }
  0x67   : > { %p470_p10 = pnand %p469_p0, %p691_p11  ;;  %p476_p13 = scmp.lt.s32.totalorder %s474_s4, %s468_s13 }
  0x69   : > { %p471_p9 = pneg %p470_p10  ;;  %p477_p2 = por %p476_p13, %p475_p12 }
  0x6b   : > { %p478_p6 = pnand %p477_p2, %p471_p9 }
  0x6d   : > { %481 = shalt.err (!%p478_p6)
}
  0x6e   : > { %s482_s5 = scalar_lea.hbm %s773_s19, 64  ;;  %s486_s1 = scalar_lea.hbm %s827_s2, 256 }
  0x6f   : > { %p483_p1 = scmp.ne.s32.totalorder %s773_s19, %s482_s5  ;;  %p487_p8 = scmp.lt.u32.totalorder %s773_s19, %s827_s2 }
  0x70   : > { %p488_p4 = scmp.lt.u32.totalorder %s486_s1, %s482_s5  ;;  %p490_p0 = scmp.lt.u32.totalorder %s482_s5, %s773_s19 }
  0x71   : > { %p484_p3 = pnand %p483_p1, %p691_p11 }
  0x72   : > { %p489_p7 = por %p488_p4, %p487_p8 }
  0x73   : > { %p485_p5 = pneg %p484_p3 }
  0x74   : > { %p491_p10 = por %p490_p0, %p489_p7 }
  0x76   : > { %p492_p9 = pnand %p491_p10, %p485_p5 }
  0x78   : > { %495 = shalt.err (!%p492_p9)
}
  0x79   : > { %327 = dma.vmem_to_hbm [thread:$0]  (%p691_p11), %s768_s23, 64, %s773_s19, %s198_s3  }
  0x7a PF: > { %p344_p12 = scmp.ge.s32.totalorder %s570_s16, 2  ;;  %s225_s26 = sand.u32 1, %s542_s9  }
  0x7b   : > { %p847_p13 = scmp.ne.s32.totalorder %s836_s21, 0  ;;  %s226_s6 = scalar_lea.sflag [#allocation4], %s225_s26 }
  0x7d   : > { %p338_p2 = pnand %p344_p12, %p847_p13 }
  0x7f   : > { %537 = dma.done.wait (!%p338_p2), %s226_s6, 64  }
  0x80   : > { %539 = vsyncadd (!%p338_p2), %s226_s6, 4294967232  ;;  %s19_s16 = sadd.s32 1, %s570_s16   ;;  %s848_s25 = sld [smem:[#allocation11_spill]] }
  0x81   : > { %p16_p6 = scmp.ge.s32.totalorder %s19_s16, 6   ;;  %s849_s9 = smov %s546_s10 }
  0x82   : > { %s850_s10 = smov %s550_s11  ;;  %s851_s11 = smov %s710_s7 }
  0x83   : > { %s852_s12 = smov %s562_s14  ;;  %s853_s13 = smov %s566_s15 }
  0x84   : > { %s855_s15 = smov %s861_s18  ;;  %18 = sbr.rel (!%p16_p6) target bundleno = 10 (0xa), region = 77 }
  0x86   : > { %s854_s14 = smov %s848_s25 }
  0x8b   :  { %231 = vsyncpa [#allocation3], 1 }
  0x8c   :  { %233 = vsyncpa [#allocation3 + $0x1], 1 }
  0x8d   :  { %234 = vsyncpa [#allocation6], 1 }
  0x8e   :  { %235 = vsyncpa [#allocation4], 1 }
  0x8f   :  { %237 = vsyncpa [#allocation4 + $0x1], 1 }

</bundles_post_ra>
